<compile_context>
chip_gen: v5e
topology: v5e:2x2
jax: 0.10.0
libtpu: 0.0.40
codegen_flags: <defaults>
</compile_context>

<pallas_src>
import jax
import jax.numpy as jnp
from jax.experimental import pallas as pl
from jax.experimental.pallas import tpu as pltpu


def _round_up(x, m):
    return ((x + m - 1) // m) * m


# ----------------------------------------------------------------------------
# Fused kernel: conv (k_max accumulated matmuls) -> bias -> ReLU -> mask ->
#               max-over-time -> FC -> padded logits
# ----------------------------------------------------------------------------
def _textcnn_fused_kernel(x_ref, w_ref, b_ref, mask_ref, fcw_ref, fcb_ref, o_ref):
    TB, LP, E = x_ref.shape            # (batch tile, L + k_max - 1, embed dim), bf16
    NF = w_ref.shape[1]                # round_up(sum(filter_num), 128)
    L = mask_ref.shape[0]              # original sequence length
    k_max = LP - L + 1                 # static

    x = x_ref[...]                     # (TB, LP, E) bf16, loaded once

    # Conv for ALL filter sizes as k_max accumulated MXU matmuls with K = E.
    # out[t, f] = sum_j sum_e x[t+j, e] * w[f, j, e]
    acc = jnp.zeros((TB * L, NF), jnp.float32)
    for j in range(k_max):
        xj = x[:, j:j + L, :].reshape(TB * L, E)                         # bf16
        acc = acc + jnp.dot(xj, w_ref[j * E:(j + 1) * E, :],
                            preferred_element_type=jnp.float32)

    # bias + ReLU in f32, then zero out invalid (partial-window) positions with a
    # precomputed 0/1 mask.  ReLU >= 0, so masking-to-0 before the max is exact.
    acc = jnp.maximum(acc + b_ref[...], 0.0)
    acc3 = acc.reshape(TB, L, NF) * mask_ref[...][None, :, :]
    pooled = jnp.max(acc3, axis=1)                                       # (TB, NF)

    # FC: weights pre-transposed to (NF, CP) in the wrapper -> no in-kernel .T
    logits = jnp.dot(pooled.astype(fcw_ref.dtype), fcw_ref[...],
                     preferred_element_type=jnp.float32) + fcb_ref[...]  # (TB, CP)
    o_ref[...] = logits


def textcnn_fused(x_pad, w_all, b_all, mask, fcw, fcb, *, TB):
    Bp, LP, E = x_pad.shape
    KE, NF = w_all.shape
    L = mask.shape[0]
    CP = fcw.shape[1]
    assert Bp % TB == 0
    grid = (Bp // TB,)

    return pl.pallas_call(
        _textcnn_fused_kernel,
        out_shape=jax.ShapeDtypeStruct((Bp, CP), jnp.float32),
        grid=grid,
        in_specs=[
            pl.BlockSpec((TB, LP, E), lambda i: (i, 0, 0)),   # bf16 activations
            pl.BlockSpec((KE, NF), lambda i: (0, 0)),         # fused conv weights (bf16)
            pl.BlockSpec((1, NF), lambda i: (0, 0)),          # fused conv bias (f32)
            pl.BlockSpec((L, NF), lambda i: (0, 0)),          # 0/1 valid-time mask (f32)
            pl.BlockSpec((NF, CP), lambda i: (0, 0)),         # FC weight, pre-T (bf16)
            pl.BlockSpec((1, CP), lambda i: (0, 0)),          # FC bias (f32)
        ],
        out_specs=pl.BlockSpec((TB, CP), lambda i: (i, 0)),
        compiler_params=pltpu.CompilerParams(
            dimension_semantics=("parallel",),
            vmem_limit_bytes=64 * 1024 * 1024,
        ),
    )(x_pad, w_all, b_all, mask, fcw, fcb)


# ----------------------------------------------------------------------------
# One-time (model-load) weight packing: lane-dense, contiguous, bf16
# ----------------------------------------------------------------------------
def prepare_textcnn(params, filter_sizes, L):
    E = params['embedding'].shape[1]
    C = params['fc_w'].shape[0]
    k_max = max(filter_sizes)
    assert L >= k_max, "sequence length must be >= max(filter_sizes)"
    KE = k_max * E
    f_sizes = [params[f'conv{k}_w'].shape[0] for k in filter_sizes]
    total_F = sum(f_sizes)
    NF = _round_up(total_F, 128)       # contiguous packing, single lane pad
    CP = _round_up(C, 128)

    w_all = jnp.zeros((KE, NF), jnp.float32)
    b_all = jnp.zeros((1, NF), jnp.float32)
    mask = jnp.zeros((L, NF), jnp.float32)
    fcw = jnp.zeros((NF, CP), jnp.float32)
    fcb = jnp.zeros((1, CP), jnp.float32)

    off = 0
    for k, F in zip(filter_sizes, f_sizes):
        w = params[f'conv{k}_w']                               # (F, k, E)
        for j in range(k):
            w_all = w_all.at[j * E:(j + 1) * E, off:off + F].set(w[:, j, :].T)
        b_all = b_all.at[0, off:off + F].set(params[f'conv{k}_b'])
        mask = mask.at[:L - k + 1, off:off + F].set(1.0)       # valid output positions
        fcw = fcw.at[off:off + F, :C].set(params['fc_w'][:, off:off + F].T)
        off += F
    fcb = fcb.at[0, :C].set(params['fc_b'])

    return {
        'emb_table': params['embedding'].astype(jnp.bfloat16),
        'w_all': w_all.astype(jnp.bfloat16),
        'b_all': b_all,
        'mask': mask,
        'fcw': fcw.astype(jnp.bfloat16),
        'fcb': fcb,
    }


# ----------------------------------------------------------------------------
# Forward (jitted): embedding gather -> pad -> fused kernel
# ----------------------------------------------------------------------------
def _pick_tb(B, L):
    # Small problem: one grid step, block == full array (no (8,·) constraint issue).
    if B * L <= 2048 or B <= 8:
        return B
    # Otherwise sublane-aligned batch tiles targeting ~2k rows of TB*L per step.
    return max(8, min(_round_up(B, 8), _round_up(max(1, 2048 // L), 8)))


def textcnn_forward_padded(tokens, packed):
    """Returns lane-padded logits (B_pad, CP); caller slices [:B, :class_num]."""
    emb_table = packed['emb_table']
    w_all = packed['w_all']
    B, L = tokens.shape
    E = emb_table.shape[1]
    k_max = w_all.shape[0] // E
    LP = L + k_max - 1

    # Embedding lookup in bf16 (XLA gather; see TODO about fusing it in-kernel).
    emb = jnp.take(emb_table, tokens, axis=0)                  # (B, L, E) bf16

    TB = _pick_tb(B, L)
    Bp = _round_up(B, TB)
    x = jnp.zeros((Bp, LP, E), jnp.bfloat16)                   # seq + batch zero pad
    x = jax.lax.dynamic_update_slice(x, emb, (0, 0, 0))

    return textcnn_fused(x, w_all, packed['b_all'], packed['mask'],
                         packed['fcw'], packed['fcb'], TB=TB)


# ----------------------------------------------------------------------------
# Pure-JAX f32 reference (mirrors the PyTorch forward) for correctness check
# ----------------------------------------------------------------------------
def textcnn_reference(tokens, params, filter_sizes):
    emb = jnp.take(params['embedding'], tokens, axis=0)
    L = emb.shape[1]
    pooled = []
    for k in filter_sizes:
        w = params[f'conv{k}_w']                               # (F, k, E)
        b = params[f'conv{k}_b']
        L_out = L - k + 1
        acc = 0.0
        for j in range(k):
            acc = acc + jnp.einsum('ble,fe->blf', emb[:, j:j + L_out, :], w[:, j, :])
        acc = jnp.maximum(acc + b[None, None, :], 0.0)
        pooled.append(jnp.max(acc, axis=1))
    feats = jnp.concatenate(pooled, axis=1)
    return feats @ params['fc_w'].T + params['fc_b'][None, :]


# ----------------------------------------------------------------------------
# Parameter construction (deterministic, synthetic, PyTorch-style shapes)
# ----------------------------------------------------------------------------
def make_params(key, vocab, embed_dim, filter_num, filter_sizes, class_num):
    keys = jax.random.split(key, 3 + 2 * len(filter_sizes))
    params = {}
    params['embedding'] = jax.random.normal(keys[0], (vocab, embed_dim), jnp.float32) * 0.1
    for i, k in enumerate(filter_sizes):
        params[f'conv{k}_w'] = jax.random.normal(
            keys[1 + 2 * i], (filter_num, k, embed_dim), jnp.float32) * 0.1
        params[f'conv{k}_b'] = jax.random.normal(
            keys[2 + 2 * i], (filter_num,), jnp.float32) * 0.01
    d = filter_num * len(filter_sizes)
    params['fc_w'] = jax.random.normal(keys[-2], (class_num, d), jnp.float32) * 0.1
    params['fc_b'] = jax.random.normal(keys[-1], (class_num,), jnp.float32) * 0.01
    return params


if __name__ == "__main__":
    B, L = 2, 16               # batch, sequence length
    VOCAB, E = 50, 32          # vocabulary size, embedding dim
    FILTER_NUM = 8
    FILTER_SIZES = (3, 4, 5)
    CLASS_NUM = 4

    key = jax.random.PRNGKey(0)
    k_tok, k_par = jax.random.split(key)

    tokens = jax.random.randint(k_tok, (B, L), 0, VOCAB, dtype=jnp.int32)
    params = make_params(k_par, VOCAB, E, FILTER_NUM, FILTER_SIZES, CLASS_NUM)

    # One-time weight packing (model-load time), hoisted out of the forward path.
    packed = prepare_textcnn(params, FILTER_SIZES, L)

    fwd = jax.jit(textcnn_forward_padded)
    logits = fwd(tokens, packed)[:B, :CLASS_NUM]               # drop lane/batch padding
    logits = jax.block_until_ready(logits)

    ref = jax.block_until_ready(textcnn_reference(tokens, params, FILTER_SIZES))

    assert logits.shape == (B, CLASS_NUM), logits.shape
    assert logits.dtype == jnp.float32
    # bf16 matmul inputs (f32 accumulation) -> relaxed tolerance vs. the f32 reference.
    assert jnp.allclose(logits, ref, atol=1e-2, rtol=1e-2), (logits, ref)
    print("KERNEL_OK")
</pallas_src>

<mosaic_0001>
module attributes {stable_mosaic.version = 11 : i64} {
  func.func @_textcnn_fused_kernel(%arg0: i32, %arg1: memref<2x20x32xbf16, #tpu.memory_space<vmem>>, %arg2: memref<160x128xbf16, #tpu.memory_space<vmem>>, %arg3: memref<1x128xf32, #tpu.memory_space<vmem>>, %arg4: memref<16x128xf32, #tpu.memory_space<vmem>>, %arg5: memref<128x128xbf16, #tpu.memory_space<vmem>>, %arg6: memref<1x128xf32, #tpu.memory_space<vmem>>, %arg7: memref<2x128xf32, #tpu.memory_space<vmem>>) attributes {dimension_semantics = [#tpu.dimension_semantics<parallel>], iteration_bounds = array<i64: 1>, scalar_prefetch = 0 : i64, scratch_operands = 0 : i64, tpu.core_type = #tpu.core_type<tc>, window_params = [{transform_indices = @transform_0, window_bounds = array<i64: 2, 20, 32>}, {pipeline_mode = #tpu.pipeline_mode<synchronous>, transform_indices = @transform_1, window_bounds = array<i64: 160, 128>}, {pipeline_mode = #tpu.pipeline_mode<synchronous>, transform_indices = @transform_2, window_bounds = array<i64: 1, 128>}, {pipeline_mode = #tpu.pipeline_mode<synchronous>, transform_indices = @transform_3, window_bounds = array<i64: 16, 128>}, {pipeline_mode = #tpu.pipeline_mode<synchronous>, transform_indices = @transform_4, window_bounds = array<i64: 128, 128>}, {pipeline_mode = #tpu.pipeline_mode<synchronous>, transform_indices = @transform_5, window_bounds = array<i64: 1, 128>}, {transform_indices = @transform_6, window_bounds = array<i64: 2, 128>}]} {
    %c0 = arith.constant 0 : index
    %c0_0 = arith.constant 0 : index
    %c0_1 = arith.constant 0 : index
    %0 = vector.load %arg1[%c0, %c0_0, %c0_1] : memref<2x20x32xbf16, #tpu.memory_space<vmem>>, vector<2x20x32xbf16>
    %cst = arith.constant 0.000000e+00 : f32
    %1 = vector.broadcast %cst : f32 to vector<32x128xf32>
    %2 = vector.extract_strided_slice %0 {offsets = [0, 0, 0], sizes = [2, 16, 32], strides = [1, 1, 1]} : vector<2x20x32xbf16> to vector<2x16x32xbf16>
    %3 = vector.shape_cast %2 : vector<2x16x32xbf16> to vector<32x32xbf16>
    %c0_2 = arith.constant 0 : index
    %c0_3 = arith.constant 0 : index
    %4 = vector.load %arg2[%c0_2, %c0_3] : memref<160x128xbf16, #tpu.memory_space<vmem>>, vector<32x128xbf16>
    %cst_4 = arith.constant dense<0.000000e+00> : vector<32x128xf32>
    %5 = tpu.matmul %3, %4, %cst_4 {dimension_numbers = #tpu.dot_dimension_numbers<[1], [0], [0], [1], [0, 0, 1, 1], [], []>} : vector<32x32xbf16>, vector<32x128xbf16>, vector<32x128xf32> -> vector<32x128xf32>
    %6 = arith.addf %1, %5 : vector<32x128xf32>
    %7 = vector.extract_strided_slice %0 {offsets = [0, 1, 0], sizes = [2, 16, 32], strides = [1, 1, 1]} : vector<2x20x32xbf16> to vector<2x16x32xbf16>
    %8 = vector.shape_cast %7 : vector<2x16x32xbf16> to vector<32x32xbf16>
    %c32 = arith.constant 32 : index
    %c0_5 = arith.constant 0 : index
    %9 = vector.load %arg2[%c32, %c0_5] : memref<160x128xbf16, #tpu.memory_space<vmem>>, vector<32x128xbf16>
    %cst_6 = arith.constant dense<0.000000e+00> : vector<32x128xf32>
    %10 = tpu.matmul %8, %9, %cst_6 {dimension_numbers = #tpu.dot_dimension_numbers<[1], [0], [0], [1], [0, 0, 1, 1], [], []>} : vector<32x32xbf16>, vector<32x128xbf16>, vector<32x128xf32> -> vector<32x128xf32>
    %11 = arith.addf %6, %10 : vector<32x128xf32>
    %12 = vector.extract_strided_slice %0 {offsets = [0, 2, 0], sizes = [2, 16, 32], strides = [1, 1, 1]} : vector<2x20x32xbf16> to vector<2x16x32xbf16>
    %13 = vector.shape_cast %12 : vector<2x16x32xbf16> to vector<32x32xbf16>
    %c64 = arith.constant 64 : index
    %c0_7 = arith.constant 0 : index
    %14 = vector.load %arg2[%c64, %c0_7] : memref<160x128xbf16, #tpu.memory_space<vmem>>, vector<32x128xbf16>
    %cst_8 = arith.constant dense<0.000000e+00> : vector<32x128xf32>
    %15 = tpu.matmul %13, %14, %cst_8 {dimension_numbers = #tpu.dot_dimension_numbers<[1], [0], [0], [1], [0, 0, 1, 1], [], []>} : vector<32x32xbf16>, vector<32x128xbf16>, vector<32x128xf32> -> vector<32x128xf32>
    %16 = arith.addf %11, %15 : vector<32x128xf32>
    %17 = vector.extract_strided_slice %0 {offsets = [0, 3, 0], sizes = [2, 16, 32], strides = [1, 1, 1]} : vector<2x20x32xbf16> to vector<2x16x32xbf16>
    %18 = vector.shape_cast %17 : vector<2x16x32xbf16> to vector<32x32xbf16>
    %c96 = arith.constant 96 : index
    %c0_9 = arith.constant 0 : index
    %19 = vector.load %arg2[%c96, %c0_9] : memref<160x128xbf16, #tpu.memory_space<vmem>>, vector<32x128xbf16>
    %cst_10 = arith.constant dense<0.000000e+00> : vector<32x128xf32>
    %20 = tpu.matmul %18, %19, %cst_10 {dimension_numbers = #tpu.dot_dimension_numbers<[1], [0], [0], [1], [0, 0, 1, 1], [], []>} : vector<32x32xbf16>, vector<32x128xbf16>, vector<32x128xf32> -> vector<32x128xf32>
    %21 = arith.addf %16, %20 : vector<32x128xf32>
    %22 = vector.extract_strided_slice %0 {offsets = [0, 4, 0], sizes = [2, 16, 32], strides = [1, 1, 1]} : vector<2x20x32xbf16> to vector<2x16x32xbf16>
    %23 = vector.shape_cast %22 : vector<2x16x32xbf16> to vector<32x32xbf16>
    %c128 = arith.constant 128 : index
    %c0_11 = arith.constant 0 : index
    %24 = vector.load %arg2[%c128, %c0_11] : memref<160x128xbf16, #tpu.memory_space<vmem>>, vector<32x128xbf16>
    %cst_12 = arith.constant dense<0.000000e+00> : vector<32x128xf32>
    %25 = tpu.matmul %23, %24, %cst_12 {dimension_numbers = #tpu.dot_dimension_numbers<[1], [0], [0], [1], [0, 0, 1, 1], [], []>} : vector<32x32xbf16>, vector<32x128xbf16>, vector<32x128xf32> -> vector<32x128xf32>
    %26 = arith.addf %21, %25 : vector<32x128xf32>
    %c0_13 = arith.constant 0 : index
    %c0_14 = arith.constant 0 : index
    %27 = vector.load %arg3[%c0_13, %c0_14] : memref<1x128xf32, #tpu.memory_space<vmem>>, vector<1x128xf32>
    %28 = vector.broadcast %27 : vector<1x128xf32> to vector<32x128xf32>
    %29 = arith.addf %26, %28 : vector<32x128xf32>
    %cst_15 = arith.constant 0.000000e+00 : f32
    %30 = vector.broadcast %cst_15 : f32 to vector<32x128xf32>
    %31 = arith.maximumf %29, %30 : vector<32x128xf32>
    %32 = vector.shape_cast %31 : vector<32x128xf32> to vector<2x16x128xf32>
    %c0_16 = arith.constant 0 : index
    %c0_17 = arith.constant 0 : index
    %33 = vector.load %arg4[%c0_16, %c0_17] : memref<16x128xf32, #tpu.memory_space<vmem>>, vector<16x128xf32>
    %34 = vector.shape_cast %33 : vector<16x128xf32> to vector<1x16x128xf32>
    %35 = vector.broadcast %34 : vector<1x16x128xf32> to vector<2x16x128xf32>
    %36 = arith.mulf %32, %35 : vector<2x16x128xf32>
    %cst_18 = arith.constant dense<0xFF800000> : vector<2x128xf32>
    %37 = vector.multi_reduction <maximumf>, %36, %cst_18 [1] : vector<2x16x128xf32> to vector<2x128xf32>
    %38 = arith.truncf %37 : vector<2x128xf32> to vector<2x128xbf16>
    %c0_19 = arith.constant 0 : index
    %c0_20 = arith.constant 0 : index
    %39 = vector.load %arg5[%c0_19, %c0_20] : memref<128x128xbf16, #tpu.memory_space<vmem>>, vector<128x128xbf16>
    %cst_21 = arith.constant dense<0.000000e+00> : vector<2x128xf32>
    %40 = tpu.matmul %38, %39, %cst_21 {dimension_numbers = #tpu.dot_dimension_numbers<[1], [0], [0], [1], [0, 0, 1, 1], [], []>} : vector<2x128xbf16>, vector<128x128xbf16>, vector<2x128xf32> -> vector<2x128xf32>
    %c0_22 = arith.constant 0 : index
    %c0_23 = arith.constant 0 : index
    %41 = vector.load %arg6[%c0_22, %c0_23] : memref<1x128xf32, #tpu.memory_space<vmem>>, vector<1x128xf32>
    %42 = vector.broadcast %41 : vector<1x128xf32> to vector<2x128xf32>
    %43 = arith.addf %40, %42 : vector<2x128xf32>
    %c0_24 = arith.constant 0 : index
    %c0_25 = arith.constant 0 : index
    %44 = vector.load %arg7[%c0_24, %c0_25] : memref<2x128xf32, #tpu.memory_space<vmem>>, vector<2x128xf32>
    tpu.vector_store %arg7[%c0_24, %c0_25], %43 {strides = array<i32>} : memref<2x128xf32, #tpu.memory_space<vmem>>, vector<2x128xf32>,
    return
  }
  func.func @transform_0(%arg0: i32) -> (i32, i32, i32) {
    %c0_i32 = arith.constant 0 : i32
    %c0_i32_0 = arith.constant 0 : i32
    %c0_i32_1 = arith.constant 0 : i32
    return %arg0, %c0_i32, %c0_i32_0 : i32, i32, i32
  }
  func.func @transform_1(%arg0: i32) -> (i32, i32) {
    %c0_i32 = arith.constant 0 : i32
    %c0_i32_0 = arith.constant 0 : i32
    %c0_i32_1 = arith.constant 0 : i32
    return %c0_i32, %c0_i32_0 : i32, i32
  }
  func.func @transform_2(%arg0: i32) -> (i32, i32) {
    %c0_i32 = arith.constant 0 : i32
    %c0_i32_0 = arith.constant 0 : i32
    %c0_i32_1 = arith.constant 0 : i32
    return %c0_i32, %c0_i32_0 : i32, i32
  }
  func.func @transform_3(%arg0: i32) -> (i32, i32) {
    %c0_i32 = arith.constant 0 : i32
    %c0_i32_0 = arith.constant 0 : i32
    %c0_i32_1 = arith.constant 0 : i32
    return %c0_i32, %c0_i32_0 : i32, i32
  }
  func.func @transform_4(%arg0: i32) -> (i32, i32) {
    %c0_i32 = arith.constant 0 : i32
    %c0_i32_0 = arith.constant 0 : i32
    %c0_i32_1 = arith.constant 0 : i32
    return %c0_i32, %c0_i32_0 : i32, i32
  }
  func.func @transform_5(%arg0: i32) -> (i32, i32) {
    %c0_i32 = arith.constant 0 : i32
    %c0_i32_0 = arith.constant 0 : i32
    %c0_i32_1 = arith.constant 0 : i32
    return %c0_i32, %c0_i32_0 : i32, i32
  }
  func.func @transform_6(%arg0: i32) -> (i32, i32) {
    %c0_i32 = arith.constant 0 : i32
    %c0_i32_0 = arith.constant 0 : i32
    return %arg0, %c0_i32 : i32, i32
  }
}

</mosaic_0001>

<bundles_post_ra>
// kernel: textcnn_forward_padded.1
= control target key start
LH: loop header
LB: loop body
LE: loop exit
PB: predicated region body
PF: predicated region fallthrough
CT: control target
= control target key end

     0   :  { %vm35_vm0 = vsmask.f32 3328  ;;  %vm108_vm1 = vcmask 261120   ;;  %vm36_vm2 = vsmask.f32 7440  ;;  %s936_s0 = inlined_call_operand.vmem [shape: bf16[2,20,32], index: 0, kind: input, shape index: {}]   ;;  %s937_s1 = inlined_call_operand.vmem [shape: bf16[160,128], index: 1, kind: input, shape index: {}]   ;;  %s938_s2 = inlined_call_operand.vmem [shape: f32[1,128], index: 2, kind: input, shape index: {}]   ;;  %s939_s3 = inlined_call_operand.vmem [shape: f32[16,128], index: 3, kind: input, shape index: {}]   ;;  %s940_s4 = inlined_call_operand.vmem [shape: bf16[128,128], index: 4, kind: input, shape index: {}]   ;;  %s941_s5 = inlined_call_operand.vmem [shape: f32[1,128], index: 5, kind: input, shape index: {}]   ;;  %s942_s6 = inlined_call_operand.hbm [shape: f32[2,128], index: 6, kind: output, shape index: {}]  }
   0x1   :  { %v640_v0 = vld [vmem:[%s937_s1 + $0x8] sm:$0xff]  ;;  %v642_v1 = vld [vmem:[%s937_s1 + $0x18] sm:$0xff]  ;;  %v639_v2 = vld [vmem:[%s937_s1] sm:$0xff]  ;;  %vm251_vm4 = vsmask.f32 2304 }
   0x2   :  { %v641_v3 = vld [vmem:[%s937_s1 + $0x10] sm:$0xff]  ;;  %v739_v4 = vld [vmem:[%s936_s0 + $0xc] sm:$0xf]  ;;  %168 = vmatpush.bf16.msra.mxu1 %v640_v0  ;;  %657 = vmatpush.bf16.msra.mxu2 %v642_v1  ;;  %v762_v13 = vld [vmem:[%s936_s0] sm:$0xf] }
   0x3   :  { %v744_v5 = vld [vmem:[%s936_s0 + $0x10] sm:$0xf]  ;;  %v749_v6 = vld [vmem:[%s936_s0 + $0x14] sm:$0x3]  ;;  %v63_v7 = vshrl.u32 %v739_v4, 16  ;;  %v66_v8 = vshll.u32 %v739_v4, 16  ;;  %121 = vmatpush.bf16.msra.mxu0 %v642_v1  ;;  %vm802_vm3 = vmor %vm35_vm0, %vm36_vm2 }
   0x4   :  { %v72_v9 = vshll.u32 %v744_v5, 16  ;;  %v76_v10 = vshrl.u32 %v744_v5, 16  ;;  %v82_v11 = vshll.u32 %v749_v6, 16  ;;  %v644_v12 = vld [vmem:[%s937_s1 + $0x28] sm:$0xff]  ;;  %v771_v16 = vld [vmem:[%s936_s0 + $0x4] sm:$0xf] }
   0x5   :  { %v65_v14 = vrot.slane %v63_v7, 4  ;;  %v68_v15 = vrot.slane %v66_v8, 5  ;;  %v776_v17 = vld [vmem:[%s936_s0 + $0x8] sm:$0x3]  ;;  %v637_v18 = vld [vmem:[%s936_s0] sm:$0xff]  ;;  %v39_v22 = vshrl.u32 %v762_v13, 16 }
   0x6   :  { %v74_v19 = vrot.slane %v72_v9, 5  ;;  %v78_v20 = vrot.slane %v76_v10, 4  ;;  %v84_v21 = vrot.slane %v82_v11, 5  ;;  %v646_v23 = vld [vmem:[%s937_s1 + $0x38] sm:$0xff]  ;;  %169 = vmatpush.bf16.msra.mxu1 %v639_v2  ;;  %658 = vmatpush.bf16.msra.mxu2 %v641_v3  ;;  %v42_v25 = vshll.u32 %v762_v13, 16  ;;  %v645_v28 = vld [vmem:[%s937_s1 + $0x30] sm:$0xff] }
   0x7   :  { %v69_v24 = vor.u32 %v68_v15, %v65_v14  ;;  %v48_v26 = vshll.u32 %v771_v16, 16  ;;  %v52_v27 = vshrl.u32 %v771_v16, 16  ;;  %v648_v29 = vld [vmem:[%s937_s1 + $0x48] sm:$0xff]  ;;  %122 = vmatpush.bf16.msra.mxu0 %v641_v3  ;;  %v41_v32 = vrot.slane %v39_v22, 4  ;;  %v643_v34 = vld [vmem:[%s937_s1 + $0x20] sm:$0xff]  ;;  %318 = vmatpush.bf16.msra.mxu3 %v646_v23 }
   0x8   :  { %v79_v31 = vor.u32 %v78_v20, %v74_v19  ;;  %v58_v33 = vshll.u32 %v776_v17, 16  ;;  %v647_v35 = vld [vmem:[%s937_s1 + $0x40] sm:$0xff]  ;;  %v44_v37 = vrot.slane %v42_v25, 5  ;;  %vm252_vm5 = vsmask.f32 6416 }
   0x9   :  { %v70_v36 = vrot.slane %v69_v24, 4  ;;  %v50_v38 = vrot.slane %v48_v26, 5  ;;  %v54_v39 = vrot.slane %v52_v27, 4  ;;  %569 = vmatmul.msk.bf16.vlgmr.msra.gmra.mxu1 %vm108_vm1, %v637_v18  ;;  %v254_v42 = vrot.slane %v39_v22, 5 }
   0xa   :  { %234 = vmatpush.bf16.msrb.mxu2 %v644_v12  ;;  %v80_v40 = vrot.slane %v79_v31, 4  ;;  %v60_v41 = vrot.slane %v58_v33, 5  ;;  %v45_v44 = vor.u32 %v44_v37, %v41_v32  ;;  %v255_v46 = vrot.slane %v42_v25, 6 }
   0xb   :  { %386 = vmatpush.bf16.msrb.mxu0 %v648_v29  ;;  %v75_v43 = vsel %vm802_vm3, %v70_v36, %v74_v19  ;;  %v55_v45 = vor.u32 %v54_v39, %v50_v38  ;;  %v258_v49 = vrot.slane %v52_v27, 5  ;;  %v259_v50 = vrot.slane %v48_v26, 6 }
   0xc   :  { %v85_v47 = vsel %vm802_vm3, %v80_v40, %v84_v21  ;;  %v92_v48 = vunpack.c.l.b16 %v75_v43 }
   0xe   :  { %235 = vmatpush.bf16.msrb.mxu2 %v643_v34 }
   0xf   :  { %11 = vsyncpa [#allocation3], 0  ;;  %v93_v51 = vunpack.c.l.b16 %v85_v47  ;;  %v46_v52 = vrot.slane %v45_v44, 4  ;;  %v56_v53 = vrot.slane %v55_v45, 4  ;;  %319 = vmatpush.bf16.msra.mxu3 %v645_v28  ;;  %v256_v54 = vor.u32 %v255_v46, %v254_v42  ;;  %387 = vmatpush.bf16.msrb.mxu0 %v647_v35  ;;  %v638_v31 = vld [vmem:[%s936_s0 + $0xc] sm:$0xff]  ;;  %s688_s28 = smov [#allocation2]  }
  0x10   :  { %vm820_vm6 = vmor %vm251_vm4, %vm252_vm5  ;;  %v260_v56 = vor.u32 %v259_v50, %v258_v49  ;;  %v263_v57 = vshrl.u32 %v776_v17, 16  ;;  %v266_v58 = vrot.slane %v58_v33, 6  ;;  %vm183_vm7 = vcmask 1042432   ;;  %v660_v32 = vld [vmem:[%s938_s2] ss:$0 sm:$0xff]  ;;  %s532_s29 = sshll.u32 %s688_s28, 4  ;;  %s533_s29 = int_to_ptr.vmem [resolvable:$true] %s532_s29 }
  0x11   :  { %v95_v59 = vpack.c.b16 %v93_v51, %v92_v48  ;;  %v51_v60 = vsel %vm802_vm3, %v46_v52, %v50_v38  ;;  %v61_v61 = vsel %vm802_vm3, %v56_v53, %v60_v41  ;;  %v257_v62 = vrot.slane %v256_v54, 4  ;;  %s534_s7 = sshll.u32 %s942_s6, 4  ;;  %s535_s7 = int_to_ptr.hbm [resolvable:$true] %s534_s7 }
  0x12   :  { %v90_v63 = vunpack.c.l.b16 %v51_v60  ;;  %v91_v0 = vunpack.c.l.b16 %v61_v61  ;;  %v262_v1 = vrot.slane %v260_v56, 4  ;;  %v265_v2 = vrot.slane %v263_v57, 5 }
  0x13   :  { %552 = vmatmul.msk.bf16.vlgmr.msra.gmra.mxu2 %vm108_vm1, %v95_v59  ;;  %v261_v3 = vsel %vm820_vm6, %v257_v62, %v260_v56  ;;  %vm184_vm8 = vcmask 1046532   ;;  %v571_v12 = vrot.slane %v762_v13, 9  ;;  %v188_v14 = vrot.slane %v771_v16, 5 }
  0x14   :  { %v94_v15 = vpack.c.b16 %v91_v0, %v90_v63  ;;  %v267_v18 = vor.u32 %v266_v58, %v265_v2  ;;  %vm835_vm9 = vmor %vm183_vm7, %vm184_vm8  ;;  %v191_v20 = vrot.slane %v776_v17, 5  ;;  %v288_v21 = vunpack.c.l.b16 %v261_v3 }
  0x15   :  { %v190_v22 = vrot.slane %v188_v14, 4  ;;  %vm335_vm10 = vcmask 1041408   ;;  %vm336_vm11 = vcmask 1045508   ;;  %v189_v24 = vsel %vm835_vm9, %v571_v12, %v188_v14 }
  0x16   :  { %551 = vmatmul.msk.bf16.vlgmr.msra.gmra.mxu0 %vm108_vm1, %v94_v15  ;;  %v268_v23 = vsel %vm820_vm6, %v262_v1, %v267_v18  ;;  %v593_v25 = vrot.slane %v762_v13, 10  ;;  %v340_v26 = vrot.slane %v771_v16, 6  ;;  %v343_v29 = vrot.slane %v776_v17, 6  ;;  %vm855_vm12 = vmor %vm335_vm10, %vm336_vm11  ;;  %v656_v18 = vld [vmem:[%s940_s4 + $0x38] sm:$0xff] }
  0x17   :  { %v289_v27 = vunpack.c.l.b16 %v268_v23  ;;  %v192_v28 = vsel %vm835_vm9, %v190_v22, %v191_v20  ;;  %v269_v30 = vrot.slane %v63_v7, 5  ;;  %v270_v16 = vrot.slane %v66_v8, 6  ;;  %513 = vmatpush.bf16.msrb.mxu1 %v656_v18 }
  0x18   :  { %v342_v13 = vrot.slane %v340_v26, 4  ;;  %v273_v34 = vrot.slane %v76_v10, 5  ;;  %v274_v17 = vrot.slane %v72_v9, 6  ;;  %v204_v7 = vunpack.c.l.b16 %v189_v24 }
  0x19   :  { %v292_v33 = vpack.c.b16 %v289_v27, %v288_v21  ;;  %v205_v35 = vunpack.c.l.b16 %v192_v28  ;;  %v271_v36 = vor.u32 %v270_v16, %v269_v30  ;;  %v278_v37 = vshrl.u32 %v749_v6, 16  ;;  %570 = vmatmul.msk.bf16.gmra.mxu1 %vm108_vm1, %v638_v31  ;;  %v655_v21 = vld [vmem:[%s940_s4 + $0x30] sm:$0xff] }
  0x1a   :  { %v341_v38 = vsel %vm855_vm12, %v593_v25, %v340_v26  ;;  %v344_v8 = vsel %vm855_vm12, %v342_v13, %v343_v29  ;;  %v275_v39 = vor.u32 %v274_v17, %v273_v34  ;;  %v281_v10 = vrot.slane %v82_v11, 6  ;;  %v654_v26 = vld [vmem:[%s940_s4 + $0x28] sm:$0xff]  ;;  %v653_v29 = vld [vmem:[%s940_s4 + $0x20] sm:$0xff]  ;;  %v652_v34 = vld [vmem:[%s940_s4 + $0x18] sm:$0xff] }
  0x1b   :  { %591 = vmatmul.msk.bf16.vlgmr.msra.gmra.mxu3 %vm108_vm1, %v292_v33  ;;  %v272_v9 = vrot.slane %v271_v36, 4  ;;  %v280_v40 = vrot.slane %v278_v37, 5  ;;  %v356_v42 = vunpack.c.l.b16 %v341_v38  ;;  %v357_v43 = vunpack.c.l.b16 %v344_v8  ;;  %514 = vmatpush.bf16.msrb.mxu1 %v655_v21  ;;  %v651_v36 = vld [vmem:[%s940_s4 + $0x10] sm:$0xff] }
  0x1c   :  { %v277_v41 = vrot.slane %v275_v39, 4  ;;  %v208_v45 = vpack.c.b16 %v205_v35, %v204_v7  ;;  %v195_v48 = vrot.slane %v744_v5, 5  ;;  %v347_v51 = vrot.slane %v744_v5, 6 }
  0x1d   :  { %v282_v44 = vor.u32 %v281_v10, %v280_v40  ;;  %v276_v46 = vsel %vm820_vm6, %v272_v9, %v275_v39  ;;  %v360_v49 = vpack.c.b16 %v357_v43, %v356_v42  ;;  %v572_v52 = vrot.slane %v739_v4, 9  ;;  %v415_v10 = vld [vmem:[%s939_s3] sm:$0xff]  ;;  %v416_v9 = vld [vmem:[%s939_s3 + $0x8] sm:$0xff] }
  0x1e   :  { %v290_v11 = vunpack.c.l.b16 %v276_v46  ;;  %v197_v53 = vrot.slane %v195_v48, 4  ;;  %v198_v54 = vrot.slane %v749_v6, 5  ;;  %v594_v55 = vrot.slane %v739_v4, 10  ;;  %v650_v42 = vld [vmem:[%s940_s4 + $0x8] sm:$0xff] }
  0x1f   :  { %v283_v47 = vsel %vm820_vm6, %v277_v41, %v282_v44  ;;  %v349_v57 = vrot.slane %v347_v51, 4  ;;  %v350_v58 = vrot.slane %v749_v6, 6  ;;  %v196_v59 = vsel %vm835_vm9, %v572_v52, %v195_v48  ;;  %515 = vmatpush.bf16.msrb.mxu1 %v654_v26 }
  0x20   :  { %v291_v50 = vunpack.c.l.b16 %v283_v47  ;;  %v199_v60 = vsel %vm835_vm9, %v197_v53, %v198_v54  ;;  %v206_v5 = vunpack.c.l.b16 %v196_v59  ;;  %v348_v62 = vsel %vm855_vm12, %v594_v55, %v347_v51 }
  0x21   :  { %v207_v61 = vunpack.c.l.b16 %v199_v60  ;;  %v351_v63 = vsel %vm855_vm12, %v349_v57, %v350_v58  ;;  %v358_v4 = vunpack.c.l.b16 %v348_v62  ;;  %vm461_vm13 = vcmask 1041409  }
  0x22   :  { %v293_v56 = vpack.c.b16 %v291_v50, %v290_v11  ;;  %v359_v0 = vunpack.c.l.b16 %v351_v63  ;;  %v649_v11 = vld [vmem:[%s940_s4] sm:$0xff] }
  0x23   :  { %581 = vmatmul.msk.bf16.vlgmr.msrb.gmra.mxu2 %vm108_vm1, %v208_v45  ;;  %v209_v1 = vpack.c.b16 %v207_v61, %v206_v5  ;;  %516 = vmatpush.bf16.msrb.mxu1 %v653_v29 }
  0x24   :  { %v361_v6 = vpack.c.b16 %v359_v0, %v358_v4 }
  0x26   :  { %603 = vmatmul.msk.bf16.vlgmr.msrb.gmra.mxu0 %vm108_vm1, %v360_v49 }
  0x27   :  { %517 = vmatpush.bf16.msrb.mxu1 %v652_v34 }
  0x2b   :  { %592 = vmatmul.msk.bf16.gmra.mxu3 %vm108_vm1, %v293_v56  ;;  %518 = vmatpush.bf16.msrb.mxu1 %v651_v36 }
  0x2f   :  { %519 = vmatpush.bf16.msrb.mxu1 %v650_v42 }
  0x33   :  { %582 = vmatmul.msk.bf16.gmra.mxu2 %vm108_vm1, %v209_v1  ;;  %520 = vmatpush.bf16.msrb.mxu1 %v649_v11 }
  0x36   :  { %604 = vmatmul.msk.bf16.gmra.mxu0 %vm108_vm1, %v361_v6 }
  0x86   :  { %v171_v14 = vpop.f32.mrf.mxu1 }
  0x8e   :  { %v173_v23 = vpop.f32.mrf.mxu1 }
  0x93   :  { %v124_v2 = vpop.f32.mrf.mxu0 }
  0x94   :  { %v172_v22 = vadd.f32 %v171_v14, %v124_v2 }
  0x96   :  { %v129_v3 = vpop.f32.mrf.mxu2  ;;  %v176_v17 = vpop.f32.mrf.mxu1 }
  0x97   :  { %v177_v38 = vadd.f32 %v176_v17, %v129_v3 }
  0x9b   :  { %v126_v12 = vpop.f32.mrf.mxu0 }
  0x9c   :  { %v174_v30 = vadd.f32 %v173_v23, %v126_v12 }
  0x9e   :  { %v131_v15 = vpop.f32.mrf.mxu2  ;;  %v321_v19 = vpop.f32.mrf.mxu3 }
  0x9f   :  { %v178_v49 = vpop.f32.mrf.mxu1 }
  0xa0   :  { %v179_v51 = vadd.f32 %v178_v49, %v131_v15 }
  0xa3   :  { %v389_v20 = vpop.f32.mrf.mxu0 }
  0xa6   :  { %v237_v24 = vpop.f32.mrf.mxu2  ;;  %v323_v28 = vpop.f32.mrf.mxu3 }
  0xa7   :  { %v247_v25 = vadd.f32 %v237_v24, %v172_v22 }
  0xa9   :  { %v331_v27 = vadd.f32 %v321_v19, %v247_v25 }
  0xab   :  { %v399_v31 = vadd.f32 %v389_v20, %v331_v27  ;;  %v391_v13 = vpop.f32.mrf.mxu0 }
  0xad   :  { %v407_v7 = vadd.f32 %v660_v32, %v399_v31 }
  0xae   :  { %v239_v16 = vpop.f32.mrf.mxu2  ;;  %v326_v40 = vpop.f32.mrf.mxu3 }
  0xaf   :  { %v248_v33 = vadd.f32 %v239_v16, %v174_v30  ;;  %v411_v8 = vmax.f32 %v407_v7, 0.0 }
  0xb1   :  { %v332_v35 = vadd.f32 %v323_v28, %v248_v33  ;;  %v417_v46 = vmul.f32 %v415_v10, %v411_v8  ;;  %v661_v28 = vld [vmem:[%s941_s5] ss:$0 sm:$0xff] }
  0xb3   :  { %v400_v37 = vadd.f32 %v391_v13, %v332_v35  ;;  %v394_v45 = vpop.f32.mrf.mxu0 }
  0xb5   :  { %v408_v39 = vadd.f32 %v660_v32, %v400_v37 }
  0xb6   :  { %v242_v41 = vpop.f32.mrf.mxu2  ;;  %v328_v55 = vpop.f32.mrf.mxu3 }
  0xb7   :  { %v412_v43 = vmax.f32 %v408_v39, 0.0  ;;  %v249_v44 = vadd.f32 %v242_v41, %v177_v38 }
  0xb9   :  { %v418_v47 = vmul.f32 %v416_v9, %v412_v43  ;;  %v333_v48 = vadd.f32 %v326_v40, %v249_v44 }
  0xbb   :  { %v421_v50 = vmax.f32 %v417_v46, %v418_v47  ;;  %v401_v52 = vadd.f32 %v394_v45, %v333_v48  ;;  %v396_v59 = vpop.f32.mrf.mxu0 }
  0xbd   :  { %v422_v54 = vrot.slane %v421_v50, 4  ;;  %v409_v57 = vadd.f32 %v660_v32, %v401_v52 }
  0xbe   :  { %v244_v53 = vpop.f32.mrf.mxu2 }
  0xbf   :  { %v250_v56 = vadd.f32 %v244_v53, %v179_v51  ;;  %v423_v60 = vmax.f32 %v421_v50, %v422_v54  ;;  %v413_v61 = vmax.f32 %v409_v57, 0.0 }
  0xc1   :  { %v334_v58 = vadd.f32 %v328_v55, %v250_v56  ;;  %v424_v4 = vrot.slane %v423_v60, 2  ;;  %v419_v0 = vmul.f32 %v415_v10, %v413_v61 }
  0xc3   :  { %v402_v5 = vadd.f32 %v396_v59, %v334_v58  ;;  %v425_v2 = vmax.f32 %v423_v60, %v424_v4 }
  0xc5   :  { %v410_v62 = vadd.f32 %v660_v32, %v402_v5  ;;  %v426_v14 = vrot.slane %v425_v2, 1 }
  0xc7   :  { %v414_v63 = vmax.f32 %v410_v62, 0.0  ;;  %v427_v18 = vmax.f32 %v425_v2, %v426_v14 }
  0xc9   :  { %v420_v1 = vmul.f32 %v416_v9, %v414_v63  ;;  %v435_v22 = vpack.c.bf16 %v427_v18, %v427_v18 }
  0xcb   :  { %v428_v6 = vmax.f32 %v419_v0, %v420_v1  ;;  %v459_v24 = vunpack.c.l.b16 %v435_v22 }
  0xcd   :  { %v429_v3 = vrot.slane %v428_v6, 4 }
  0xcf   :  { %v430_v12 = vmax.f32 %v428_v6, %v429_v3 }
  0xd1   :  { %v431_v15 = vrot.slane %v430_v12, 2 }
  0xd3   :  { %v432_v19 = vmax.f32 %v430_v12, %v431_v15 }
  0xd5   :  { %v433_v20 = vrot.slane %v432_v19, 1 }
  0xd7   :  { %v434_v21 = vmax.f32 %v432_v19, %v433_v20 }
  0xd9   :  { %v436_v23 = vpack.c.bf16 %v434_v21, %v434_v21 }
  0xdb   :  { %v460_v25 = vunpack.c.l.b16 %v436_v23 }
  0xdd   :  { %v462_v26 = vsel %vm461_vm13, %v460_v25, %v459_v24 }
  0xde   :  { %v463_v27 = vpack.c.b16 %v462_v26, %v462_v26 }
  0xe0   :  { %521 = vmatmul.bf16.vlgmr.msrb.gmra.mxu1 %v463_v27 }
 0x15d   :  { %v522_v29 = vpop.f32.mrf.mxu1 }
 0x15e   :  { %v523_v30 = vadd.f32 %v661_v28, %v522_v29 }
 0x160   :  { %526 = vst [vmem:[#allocation2] sm:$0x3] %v523_v30 }
 0x161   :  { %537 = dma.vmem_to_hbm [thread:$0]  %s533_s29, 32, %s535_s7, [#allocation3]  }
 0x165   :  { %v524_v31 = vpop.f32.mrf.mxu1 }
 0x166   :  { %686 = dma.done.wait [#allocation3], 32  }
 0x167   :  { %687 = vsyncadd [#allocation3], 4294967264 }
 0x168   :  { %542 = vsyncpa [#allocation3], 1 }

</bundles_post_ra>
